<compile_context>
chip_gen: v5e
topology: v5e:2x2
jax: 0.10.0
libtpu: 0.0.40
codegen_flags: <defaults>
</compile_context>

<pallas_src>
import functools

import numpy as np

import jax
import jax.numpy as jnp
from jax.experimental import pallas as pl
from jax.experimental.pallas import tpu as pltpu

_LANES = 128


def _round_up(x, m):
    return ((x + m - 1) // m) * m


def _focal_loss_c2_kernel(x0_ref, x1_ref, tgt_ref, out_ref, acc_ref, *,
                          gamma, n, alpha0, alpha1, mean):
    # x0_ref/x1_ref : (TR, 128) logits for class 0 / class 1 (any float dtype)
    # tgt_ref       : (TR, 128) int32 labels in {0, 1}
    # out_ref       : (1, 1)   f32 reduced loss
    # acc_ref       : (TR, 128) f32 running per-element partial sums
    pid = pl.program_id(0)
    tr, lanes = acc_ref.shape

    @pl.when(pid == 0)
    def _():
        acc_ref[...] = jnp.zeros_like(acc_ref)

    x0 = x0_ref[...].astype(jnp.float32)
    x1 = x1_ref[...].astype(jnp.float32)
    tgt = tgt_ref[...]
    is_one = tgt == 1

    # Numerically stable binary log-sum-exp cross entropy (reduction='none').
    m = jnp.maximum(x0, x1)
    lse = m + jnp.log(jnp.exp(x0 - m) + jnp.exp(x1 - m))
    logit_t = jnp.where(is_one, x1, x0)
    ce = lse - logit_t

    # Focal modulation.
    pt = jnp.exp(-ce)
    one_minus_pt = jnp.maximum(0.0, 1.0 - pt)   # clamp fp rounding below 0

    g_int = int(gamma)
    if float(g_int) == float(gamma) and 0 <= g_int <= 8:
        if g_int == 0:
            mod = jnp.ones_like(one_minus_pt)
        else:
            mod = one_minus_pt
            for _ in range(g_int - 1):
                mod = mod * one_minus_pt
    else:
        mod = jnp.power(one_minus_pt, gamma)

    alpha_t = jnp.where(is_one, jnp.float32(alpha1), jnp.float32(alpha0))
    f_loss = alpha_t * mod * ce

    # Mask out padded elements (global flat index >= n).
    row = jax.lax.broadcasted_iota(jnp.int32, (tr, lanes), 0)
    lane = jax.lax.broadcasted_iota(jnp.int32, (tr, lanes), 1)
    gidx = (pid * tr + row) * lanes + lane
    f_loss = jnp.where(gidx < n, f_loss, 0.0)

    # Per-element accumulation (no per-tile cross-lane reduction needed).
    acc_ref[...] += f_loss

    @pl.when(pid == pl.num_programs(0) - 1)
    def _():
        scale = (1.0 / float(n)) if mean else 1.0
        out_ref[...] = (jnp.sum(acc_ref[...]) * scale).reshape(1, 1)


def focal_loss(inputs, targets, *, alpha=0.25, gamma=2.0, num_classes=2,
               reduction="mean"):
    """Pallas FocalLoss forward.

    inputs : (N, 2) float logits (any float dtype; upcast happens in-kernel)
    targets: (N,)   int labels in {0, 1}
    """
    n, c = inputs.shape
    if c != num_classes:
        raise ValueError("inputs last dim must equal num_classes")
    if num_classes != 2:
        # TODO(synk): general num_classes path (pad C to 128 lanes) not implemented.
        raise NotImplementedError("Pallas kernel implemented for num_classes == 2")
    if reduction not in ("mean", "sum"):
        # TODO(synk): reduction='none' (per-element output) not implemented.
        raise NotImplementedError("reduction must be 'mean' or 'sum'")

    # Build the per-class alpha pair exactly like the PyTorch __init__ (it is a
    # constructor constant, so static Python floats are faithful).
    if isinstance(alpha, (float, int)):
        a0, a1 = 1.0 - float(alpha), float(alpha)
    else:
        av = np.asarray(alpha, dtype=np.float32)
        if av.shape[0] != num_classes:
            raise ValueError("alpha length must equal num_classes")
        a0, a1 = float(av[0]), float(av[1])

    # ---- lane-dense de-interleave + padding to a tile multiple ----
    rows = pl.cdiv(n, _LANES)
    tile_rows = min(512, _round_up(rows, 8))      # >= 64K elems/tile when big
    rows_pad = _round_up(rows, tile_rows)
    n_pad = rows_pad * _LANES
    pad = n_pad - n

    x0 = inputs[:, 0]
    x1 = inputs[:, 1]
    tgt = targets.astype(jnp.int32)
    if pad:
        x0 = jnp.pad(x0, (0, pad))
        x1 = jnp.pad(x1, (0, pad))
        tgt = jnp.pad(tgt, (0, pad))
    x0 = x0.reshape(rows_pad, _LANES)
    x1 = x1.reshape(rows_pad, _LANES)
    tgt = tgt.reshape(rows_pad, _LANES)

    grid = (rows_pad // tile_rows,)
    kernel = functools.partial(
        _focal_loss_c2_kernel,
        gamma=float(gamma), n=int(n), alpha0=a0, alpha1=a1,
        mean=(reduction == "mean"))

    out = pl.pallas_call(
        kernel,
        out_shape=jax.ShapeDtypeStruct((1, 1), jnp.float32),
        grid_spec=pltpu.PrefetchScalarGridSpec(
            num_scalar_prefetch=0,
            grid=grid,
            in_specs=[
                pl.BlockSpec((tile_rows, _LANES), lambda i: (i, 0)),
                pl.BlockSpec((tile_rows, _LANES), lambda i: (i, 0)),
                pl.BlockSpec((tile_rows, _LANES), lambda i: (i, 0)),
            ],
            out_specs=pl.BlockSpec((1, 1), lambda i: (0, 0)),
            scratch_shapes=[pltpu.VMEM((tile_rows, _LANES), jnp.float32)],
        ),
        compiler_params=pltpu.CompilerParams(
            dimension_semantics=("arbitrary",),       # reduction/accumulator axis
            vmem_limit_bytes=32 * 1024 * 1024,        # small tiles, large headroom
        ),
    )(x0, x1, tgt)
    return out[0, 0]


def _focal_loss_ref(inputs, targets, *, alpha=0.25, gamma=2.0, num_classes=2):
    # Pure-JAX reference (mirrors the PyTorch module, reduction='mean').
    if isinstance(alpha, (float, int)):
        if num_classes == 2:
            alpha_vec = jnp.array([1.0 - alpha, alpha], dtype=jnp.float32)
        else:
            alpha_vec = jnp.full((num_classes,), alpha, dtype=jnp.float32)
    else:
        alpha_vec = jnp.asarray(alpha, dtype=jnp.float32)
    logp = jax.nn.log_softmax(inputs.astype(jnp.float32), axis=-1)
    ce = -jnp.take_along_axis(logp, targets[:, None], axis=-1)[:, 0]
    pt = jnp.exp(-ce)
    alpha_t = alpha_vec[targets]
    return jnp.mean(alpha_t * (1.0 - pt) ** gamma * ce)


if __name__ == "__main__":
    key = jax.random.PRNGKey(0)
    k1, k2 = jax.random.split(key)

    N, C = 8, 2  # small batch of binary-classification logits
    inputs = jax.random.normal(k1, (N, C), dtype=jnp.float32)
    targets = jax.random.randint(k2, (N,), 0, C, dtype=jnp.int32)

    loss = focal_loss(inputs, targets, alpha=0.25, gamma=2.0, num_classes=C)
    loss = jax.block_until_ready(loss)

    ref = _focal_loss_ref(inputs, targets, alpha=0.25, gamma=2.0, num_classes=C)
    assert jnp.allclose(loss, ref, rtol=1e-5, atol=1e-6), (loss, ref)

    # Also exercise a multi-tile, non-multiple-of-tile N with bf16 inputs.
    k3, k4 = jax.random.split(k1)
    N2 = 3000
    inputs2 = jax.random.normal(k3, (N2, C), dtype=jnp.bfloat16)
    targets2 = jax.random.randint(k4, (N2,), 0, C, dtype=jnp.int32)
    loss2 = jax.block_until_ready(
        focal_loss(inputs2, targets2, alpha=0.25, gamma=2.0, num_classes=C))
    ref2 = _focal_loss_ref(inputs2.astype(jnp.float32), targets2,
                           alpha=0.25, gamma=2.0, num_classes=C)
    assert jnp.allclose(loss2, ref2, rtol=2e-2, atol=1e-3), (loss2, ref2)

    print("KERNEL_OK")
</pallas_src>

<mosaic_0001>
module attributes {stable_mosaic.version = 11 : i64} {
  func.func @_focal_loss_c2_kernel(%arg0: i32, %arg1: memref<8x128xf32, #tpu.memory_space<vmem>>, %arg2: memref<8x128xf32, #tpu.memory_space<vmem>>, %arg3: memref<8x128xi32, #tpu.memory_space<vmem>>, %arg4: memref<1x1xf32, #tpu.memory_space<vmem>>, %arg5: memref<8x128xf32, #tpu.memory_space<vmem>>) attributes {dimension_semantics = [#tpu.dimension_semantics<arbitrary>], iteration_bounds = array<i64: 1>, scalar_prefetch = 0 : i64, scratch_operands = 1 : i64, tpu.core_type = #tpu.core_type<tc>, window_params = [{transform_indices = @transform_0, window_bounds = array<i64: 8, 128>}, {transform_indices = @transform_1, window_bounds = array<i64: 8, 128>}, {transform_indices = @transform_2, window_bounds = array<i64: 8, 128>}, {pipeline_mode = #tpu.pipeline_mode<synchronous>, transform_indices = @transform_3, window_bounds = array<i64: 1, 1>}]} {
    %c0_i32 = arith.constant 0 : i32
    %0 = arith.cmpi eq, %arg0, %c0_i32 : i32
    %1 = arith.extui %0 : i1 to i32
    %c0_i32_0 = arith.constant 0 : i32
    %2 = arith.cmpi ne, %1, %c0_i32_0 : i32
    scf.if %2 {
      %cst_18 = arith.constant 0.000000e+00 : f32
      %49 = vector.broadcast %cst_18 : f32 to vector<8x128xf32>
      %c0_19 = arith.constant 0 : index
      %c0_20 = arith.constant 0 : index
      %50 = vector.load %arg5[%c0_19, %c0_20] : memref<8x128xf32, #tpu.memory_space<vmem>>, vector<8x128xf32>
      tpu.vector_store %arg5[%c0_19, %c0_20], %49 {strides = array<i32>} : memref<8x128xf32, #tpu.memory_space<vmem>>, vector<8x128xf32>,
    } else {
    }
    %c0 = arith.constant 0 : index
    %c0_1 = arith.constant 0 : index
    %3 = vector.load %arg1[%c0, %c0_1] : memref<8x128xf32, #tpu.memory_space<vmem>>, vector<8x128xf32>
    %c0_2 = arith.constant 0 : index
    %c0_3 = arith.constant 0 : index
    %4 = vector.load %arg2[%c0_2, %c0_3] : memref<8x128xf32, #tpu.memory_space<vmem>>, vector<8x128xf32>
    %c0_4 = arith.constant 0 : index
    %c0_5 = arith.constant 0 : index
    %5 = vector.load %arg3[%c0_4, %c0_5] : memref<8x128xi32, #tpu.memory_space<vmem>>, vector<8x128xi32>
    %c1_i32 = arith.constant 1 : i32
    %6 = vector.broadcast %c1_i32 : i32 to vector<8x128xi32>
    %7 = arith.cmpi eq, %5, %6 : vector<8x128xi32>
    %8 = arith.maximumf %3, %4 : vector<8x128xf32>
    %9 = arith.subf %3, %8 : vector<8x128xf32>
    %10 = math.exp %9 : vector<8x128xf32>
    %11 = arith.subf %4, %8 : vector<8x128xf32>
    %12 = math.exp %11 : vector<8x128xf32>
    %13 = arith.addf %10, %12 : vector<8x128xf32>
    %14 = math.log %13 : vector<8x128xf32>
    %15 = arith.addf %8, %14 : vector<8x128xf32>
    %16 = arith.select %7, %4, %3 : vector<8x128xi1>, vector<8x128xf32>
    %17 = arith.subf %15, %16 : vector<8x128xf32>
    %cst = arith.constant 0.000000e+00 : f32
    %18 = vector.broadcast %cst : f32 to vector<8x128xf32>
    %19 = arith.subf %18, %17 : vector<8x128xf32>
    %20 = math.exp %19 : vector<8x128xf32>
    %cst_6 = arith.constant 1.000000e+00 : f32
    %21 = vector.broadcast %cst_6 : f32 to vector<8x128xf32>
    %22 = arith.subf %21, %20 : vector<8x128xf32>
    %cst_7 = arith.constant 0.000000e+00 : f32
    %23 = vector.broadcast %cst_7 : f32 to vector<8x128xf32>
    %24 = arith.maximumf %23, %22 : vector<8x128xf32>
    %25 = arith.mulf %24, %24 : vector<8x128xf32>
    %cst_8 = arith.constant 2.500000e-01 : f32
    %cst_9 = arith.constant 7.500000e-01 : f32
    %26 = vector.broadcast %cst_8 : f32 to vector<8x128xf32>
    %27 = vector.broadcast %cst_9 : f32 to vector<8x128xf32>
    %28 = arith.select %7, %26, %27 : vector<8x128xi1>, vector<8x128xf32>
    %29 = arith.mulf %28, %25 : vector<8x128xf32>
    %30 = arith.mulf %29, %17 : vector<8x128xf32>
    %31 = tpu.iota {dimensions = array<i32: 0>} : vector<8x128xi32>
    %32 = tpu.iota {dimensions = array<i32: 1>} : vector<8x128xi32>
    %c8_i32 = arith.constant 8 : i32
    %33 = arith.muli %arg0, %c8_i32 : i32
    %34 = vector.broadcast %33 : i32 to vector<8x128xi32>
    %35 = arith.addi %34, %31 : vector<8x128xi32>
    %c128_i32 = arith.constant 128 : i32
    %36 = vector.broadcast %c128_i32 : i32 to vector<8x128xi32>
    %37 = arith.muli %35, %36 : vector<8x128xi32>
    %38 = arith.addi %37, %32 : vector<8x128xi32>
    %c8_i32_10 = arith.constant 8 : i32
    %39 = vector.broadcast %c8_i32_10 : i32 to vector<8x128xi32>
    %40 = arith.cmpi slt, %38, %39 : vector<8x128xi32>
    %cst_11 = arith.constant 0.000000e+00 : f32
    %41 = vector.broadcast %cst_11 : f32 to vector<8x128xf32>
    %42 = arith.select %40, %30, %41 : vector<8x128xi1>, vector<8x128xf32>
    %c0_12 = arith.constant 0 : index
    %c0_13 = arith.constant 0 : index
    %43 = vector.load %arg5[%c0_12, %c0_13] : memref<8x128xf32, #tpu.memory_space<vmem>>, vector<8x128xf32>
    %44 = arith.addf %43, %42 : vector<8x128xf32>
    %c0_14 = arith.constant 0 : index
    %c0_15 = arith.constant 0 : index
    %45 = vector.load %arg5[%c0_14, %c0_15] : memref<8x128xf32, #tpu.memory_space<vmem>>, vector<8x128xf32>
    tpu.vector_store %arg5[%c0_14, %c0_15], %44 {strides = array<i32>} : memref<8x128xf32, #tpu.memory_space<vmem>>, vector<8x128xf32>,
    %c0_i32_16 = arith.constant 0 : i32
    %46 = arith.cmpi eq, %arg0, %c0_i32_16 : i32
    %47 = arith.extui %46 : i1 to i32
    %c0_i32_17 = arith.constant 0 : i32
    %48 = arith.cmpi ne, %47, %c0_i32_17 : i32
    scf.if %48 {
      %c0_18 = arith.constant 0 : index
      %c0_19 = arith.constant 0 : index
      %49 = vector.load %arg5[%c0_18, %c0_19] : memref<8x128xf32, #tpu.memory_space<vmem>>, vector<8x128xf32>
      %50 = vector.shape_cast %49 : vector<8x128xf32> to vector<1x8x128xf32>
      %cst_20 = arith.constant dense<0.000000e+00> : vector<1xf32>
      %51 = vector.multi_reduction <add>, %50, %cst_20 [1, 2] : vector<1x8x128xf32> to vector<1xf32>
      %52 = vector.shape_cast %51 : vector<1xf32> to vector<1x1x1xf32>
      %53 = vector.extract %52[0, 0, 0] : f32 from vector<1x1x1xf32>
      %cst_21 = arith.constant 1.250000e-01 : f32
      %54 = arith.mulf %53, %cst_21 : f32
      %55 = vector.broadcast %54 : f32 to vector<1x1xf32>
      %c0_22 = arith.constant 0 : index
      %c0_23 = arith.constant 0 : index
      %56 = vector.load %arg4[%c0_22, %c0_23] : memref<1x1xf32, #tpu.memory_space<vmem>>, vector<1x1xf32>
      tpu.vector_store %arg4[%c0_22, %c0_23], %55 {strides = array<i32>} : memref<1x1xf32, #tpu.memory_space<vmem>>, vector<1x1xf32>,
    } else {
    }
    return
  }
  func.func @transform_0(%arg0: i32) -> (i32, i32) {
    %c0_i32 = arith.constant 0 : i32
    %c0_i32_0 = arith.constant 0 : i32
    return %arg0, %c0_i32 : i32, i32
  }
  func.func @transform_1(%arg0: i32) -> (i32, i32) {
    %c0_i32 = arith.constant 0 : i32
    %c0_i32_0 = arith.constant 0 : i32
    return %arg0, %c0_i32 : i32, i32
  }
  func.func @transform_2(%arg0: i32) -> (i32, i32) {
    %c0_i32 = arith.constant 0 : i32
    %c0_i32_0 = arith.constant 0 : i32
    return %arg0, %c0_i32 : i32, i32
  }
  func.func @transform_3(%arg0: i32) -> (i32, i32) {
    %c0_i32 = arith.constant 0 : i32
    %c0_i32_0 = arith.constant 0 : i32
    %c0_i32_1 = arith.constant 0 : i32
    return %c0_i32, %c0_i32_0 : i32, i32
  }
}

</mosaic_0001>

<bundles_post_ra>
// kernel: tpu_custom_call.1
= control target key start
LH: loop header
LB: loop body
LE: loop exit
PB: predicated region body
PF: predicated region fallthrough
CT: control target
= control target key end

     0   :  { %8 = vsyncpa [#allocation4], 0  ;;  %s292_s0 = inlined_call_operand.hbm [shape: f32[8,128], index: 0, kind: input, shape index: {}]   ;;  %s293_s1 = inlined_call_operand.hbm [shape: f32[8,128], index: 1, kind: input, shape index: {}]   ;;  %s294_s2 = inlined_call_operand.hbm [shape: s32[8,128], index: 2, kind: input, shape index: {}]   ;;  %s295_s3 = inlined_call_operand.hbm [shape: f32[1,1], index: 3, kind: output, shape index: {}]  }
   0x1   :  { %9 = vsyncpa [#allocation7], 0  ;;  %s27_s14 = sshll.u32 %s293_s1, 4  ;;  %s28_s14 = int_to_ptr.hbm [resolvable:$true] %s27_s14 }
   0x2   :  { %10 = vsyncpa [#allocation5], 0  ;;  %s253_s15 = smov [#allocation6]   ;;  %s16_s19 = sshll.u32 %s292_s0, 4  ;;  %s17_s19 = int_to_ptr.hbm [resolvable:$true] %s16_s19 }
   0x3   :  { %s29_s16 = sshll.u32 %s253_s15, 4  ;;  %s254_s20 = smov [#allocation3]   ;;  %s30_s16 = int_to_ptr.vmem [resolvable:$true] %s29_s16 }
   0x4   :  { %32 = dma.hbm_to_vmem [thread:$0]  %s28_s14, 128, %s30_s16, [#allocation7]  }
   0x5   :  { %s18_s21 = sshll.u32 %s254_s20, 4  ;;  %s38_s24 = sshll.u32 %s294_s2, 4  ;;  %s19_s21 = int_to_ptr.vmem [resolvable:$true] %s18_s21  ;;  %s39_s24 = int_to_ptr.hbm [resolvable:$true] %s38_s24 }
   0x6   :  { %21 = dma.hbm_to_vmem [thread:$0]  %s17_s19, 128, %s19_s21, [#allocation4]  }
   0x7   :  { %s255_s1 = smov [#allocation8]  }
   0x8   :  { %s40_s25 = sshll.u32 %s255_s1, 4  ;;  %s41_s25 = int_to_ptr.vmem [resolvable:$true] %s40_s25 }
   0x9   :  { %43 = dma.hbm_to_vmem [thread:$0]  %s39_s24, 128, %s41_s25, [#allocation7]  }
   0xa   :  { %247 = dma.done.wait [#allocation4], 128  }
   0xb   :  { %248 = vsyncadd [#allocation4], 4294967168 }
   0xc   :  { %249 = dma.done.wait [#allocation7], 256  }
   0xd   :  { %250 = vsyncadd [#allocation7], 4294967040  ;;  %v61_v0 = vld [vmem:[#allocation3] sm:$0xff]  ;;  %v62_v1 = vld [vmem:[#allocation6] sm:$0xff]  ;;  %v87_v18 = vlaneseq  ;;  %v256_v25 = vmov 0.75   ;;  %s257_s0 = smov [#allocation9]  }
   0xe   :  { %v65_v2 = vmax.f32 %v61_v0, %v62_v1  ;;  %v63_v10 = vld [vmem:[#allocation8] sm:$0xff]  ;;  %s123_s2 = sshll.u32 %s257_s0, 4  ;;  %s125_s28 = sshll.u32 %s295_s3, 4  ;;  %vm116_vm2 = vcmask 0   ;;  %s124_s2 = int_to_ptr.vmem [resolvable:$true] %s123_s2  ;;  %s126_s28 = int_to_ptr.hbm [resolvable:$true] %s125_s28 }
   0xf   :  { %vm64_vm0 = vcmp.eq.s32.totalorder %v63_v10, 1  ;;  %v88_v19 = vshrl.u32 %v87_v18, 7  ;;  %v90_v21 = vand.u32 127, %v87_v18 }
  0x10   :  { %v66_v3 = vsub.f32 %v61_v0, %v65_v2  ;;  %v69_v4 = vsub.f32 %v62_v1, %v65_v2  ;;  %v76_v13 = vsel %vm64_vm0, %v62_v1, %v61_v0  ;;  %v84_v26 = vsel %vm64_vm0, 0.25, %v256_v25 }
  0x11   :  { %v94_v22 = vmul.u32 128, %v88_v19 }
  0x12   :  { %v67_v5 = vmul.f32 1.442695, %v66_v3  ;;  %v70_v6 = vmul.f32 1.442695, %v69_v4 }
  0x13   :  { %v95_v27 = vadd.s32 %v94_v22, %v90_v21 }
  0x14   :  { %143 = vpow2.f32 %v67_v5 }
  0x15   :  { %145 = vpow2.f32 %v70_v6  ;;  %vm96_vm1 = vcmp.lt.s32.totalorder %v95_v27, 8 }
  0x1a   :  { %v144_v7 = vpop.eup %143 }
  0x1b   :  { %v146_v8 = vpop.eup %145 }
  0x1c   :  { %v72_v9 = vadd.f32 %v146_v8, %v144_v7 }
  0x1e   :  { %147 = vlog2.f32 %v72_v9 }
  0x24   :  { %v148_v11 = vpop.eup %147 }
  0x25   :  { %v74_v12 = vmul.f32 0.6931472, %v148_v11 }
  0x27   :  { %v75_v14 = vadd.f32 %v74_v12, %v65_v2 }
  0x29   :  { %v77_v15 = vsub.f32 %v75_v14, %v76_v13 }
  0x2b   :  { %v78_v16 = vsub.f32 0.0, %v77_v15 }
  0x2d   :  { %v79_v17 = vmul.f32 1.442695, %v78_v16 }
  0x2f   :  { %149 = vpow2.f32 %v79_v17 }
  0x35   :  { %v150_v20 = vpop.eup %149 }
  0x36   :  { %v81_v23 = vsub.f32 1.0, %v150_v20 }
  0x38   :  { %v82_v24 = vmax.f32 %v81_v23, 0.0 }
  0x3a   :  { %v83_v28 = vmul.f32 %v82_v24, %v82_v24 }
  0x3c   :  { %v85_v29 = vmul.f32 %v84_v26, %v83_v28 }
  0x3e   :  { %v86_v30 = vmul.f32 %v85_v29, %v77_v15 }
  0x40   :  { %v97_v31 = vsel %vm96_vm1, %v86_v30, 0.0 }
  0x41   :  { %105 = vadd.xlane.f32.xlu0 %v97_v31 }
  0xb4   :  { %v106_v32 = vpop.xlane.xlu0 %105 }
  0xb5   :  { %v107_v33 = vrot.slane %v106_v32, 4 }
  0xb7   :  { %v108_v34 = vadd.f32 %v107_v33, %v106_v32 }
  0xb9   :  { %v109_v35 = vrot.slane %v108_v34, 2 }
  0xbb   :  { %v110_v36 = vadd.f32 %v109_v35, %v108_v34 }
  0xbd   :  { %v111_v37 = vrot.slane %v110_v36, 1 }
  0xbf   :  { %v112_v38 = vadd.f32 %v111_v37, %v110_v36 }
  0xc1   :  { %136 = vpush %v112_v38 }
  0xf2   :  { %s137_s29 = spop %136 }
  0xf3   :  { %s114_s30 = smul.f32 0.125, %s137_s29 }
  0xf5   :  { %v115_v39 = vstv %s114_s30 }
  0xf6   :  { %117 = vst.msk [vmem:[#allocation9] sm:$0x1] %vm116_vm2, %v115_v39 }
  0xf7   :  { %128 = dma.vmem_to_hbm [thread:$0]  %s124_s2, 16, %s126_s28, [#allocation5]  }
  0xf8   :  { %251 = dma.done.wait [#allocation5], 16  }
  0xf9   :  { %252 = vsyncadd [#allocation5], 4294967280 }
  0xfa   :  { %133 = vsyncpa [#allocation4], 1 }
  0xfb   :  { %134 = vsyncpa [#allocation7], 1 }
  0xfc   :  { %135 = vsyncpa [#allocation5], 1 }

</bundles_post_ra>
